<compile_context>
chip_gen: v7x
topology: tpu7x:2x2x1
jax: 0.10.0
libtpu: 0.0.40
codegen_flags: <defaults>
</compile_context>

<pallas_src>
import math

import jax
import jax.numpy as jnp
from jax.experimental import pallas as pl
from jax.experimental.pallas import tpu as pltpu

BN_EPS = 1e-5
SOFTPLUS_THRESHOLD = 20.0  # PyTorch nn.Softplus default threshold
LANE = 128                 # lane width of a TPU vreg


def _round_up(n, m):
    return ((n + m - 1) // m) * m


def _mlp_bn_kernel(x_ref, w1_ref, wstack_ref, rows_ref, out_ref):
    """(Linear -> BN(train) -> ReLU) x3 -> Linear(+bias) -> Softplus, all in VMEM.

    rows_ref packs seven (1, H) per-feature vectors into one (8, H) tile:
      row 0: gamma1   row 1: beta1
      row 2: gamma2   row 3: beta2
      row 4: gamma3   row 5: beta3
      row 6: bias4    row 7: zero padding
    wstack_ref stacks the three HxH weights (w2, w3, w4) as (3, H, H).
    """
    x = x_ref[...]
    rows = rows_ref[...]
    inv_b = 1.0 / x.shape[0]  # static

    def bn_relu(h, g_row, be_row):
        # Training-mode BatchNorm1d (biased variance, eps=1e-5) folded into one
        # FMA. sum(h) and sum(h*h) are independent cross-sublane reductions so
        # the XLU can overlap them; no explicit (B,H) centering pass.
        mean = jnp.sum(h, axis=0, keepdims=True) * inv_b
        mean_sq = jnp.sum(h * h, axis=0, keepdims=True) * inv_b
        var = mean_sq - mean * mean
        scale = g_row * jax.lax.rsqrt(var + BN_EPS)   # (1, H) row only (EUP)
        shift = be_row - mean * scale
        return jnp.maximum(h * scale + shift, 0.0)

    # Layer 1-3 Linear biases omitted: exactly cancelled by BN mean subtraction.
    h = bn_relu(jnp.dot(x, w1_ref[...], preferred_element_type=jnp.float32),
                rows[0:1, :], rows[1:2, :])
    h = bn_relu(jnp.dot(h, wstack_ref[0], preferred_element_type=jnp.float32),
                rows[2:3, :], rows[3:4, :])
    h = bn_relu(jnp.dot(h, wstack_ref[1], preferred_element_type=jnp.float32),
                rows[4:5, :], rows[5:6, :])
    h = jnp.dot(h, wstack_ref[2], preferred_element_type=jnp.float32) + rows[6:7, :]

    # Softplus (beta=1, threshold=20): matches nn.Softplus defaults.
    sp = jnp.log1p(jnp.exp(jnp.minimum(h, SOFTPLUS_THRESHOLD)))
    out_ref[...] = jnp.where(h > SOFTPLUS_THRESHOLD, h, sp)


def mf_bn_net_forward(x, packed, output_size):
    """x: (B, input_size) f32. packed: lane-padded, pre-transposed, packed params."""
    batch = x.shape[0]
    hp = packed["wstack"].shape[1]
    out_pad = packed["wstack"].shape[2]

    args = (x, packed["w1"], packed["wstack"], packed["rows"])

    # Generation-aware VMEM budget: operands + output + resident activations,
    # 2x headroom, capped below the physical VMEM of the current chip
    # (64 MiB/TC on v7x, 128 MiB on v5e/v6e).
    elems = sum(int(math.prod(a.shape)) for a in args)
    elems += batch * (3 * hp + 2 * out_pad)
    try:
        info = pltpu.get_tpu_info()
        vmem_cap = int(getattr(info, "vmem_capacity_bytes", 64 * 1024 * 1024))
    except Exception:
        vmem_cap = 64 * 1024 * 1024
    vmem_limit = max(8 << 20,
                     min(vmem_cap - (12 << 20), 2 * 4 * elems + (4 << 20)))

    vmem_spec = pl.BlockSpec(memory_space=pltpu.MemorySpace.VMEM)
    out_padded = pl.pallas_call(
        _mlp_bn_kernel,
        out_shape=jax.ShapeDtypeStruct((batch, out_pad), jnp.float32),
        in_specs=[vmem_spec] * len(args),
        out_specs=vmem_spec,
        compiler_params=pltpu.CompilerParams(vmem_limit_bytes=vmem_limit),
    )(*args)
    # Lane-dense (128-wide) store inside the kernel; trim padding outside.
    return out_padded[:, :output_size]


def init_params(key, input_size, hidden_sizes, output_size):
    """PyTorch-style init: Linear ~ U(-1/sqrt(fan_in), 1/sqrt(fan_in)), BN gamma=1/beta=0.
    Weights are pre-transposed to (in_features, out_features)."""
    dims = [input_size] + list(hidden_sizes) + [output_size]
    params = {}
    keys = jax.random.split(key, 8)
    for i in range(4):
        fan_in, fan_out = dims[i], dims[i + 1]
        bound = 1.0 / (fan_in ** 0.5)
        params[f"w{i + 1}"] = jax.random.uniform(
            keys[2 * i], (fan_in, fan_out), minval=-bound, maxval=bound,
            dtype=jnp.float32)
        params[f"b{i + 1}"] = jax.random.uniform(
            keys[2 * i + 1], (1, fan_out), minval=-bound, maxval=bound,
            dtype=jnp.float32)
        if i < 3:
            params[f"g{i + 1}"] = jnp.ones((1, fan_out), jnp.float32)
            params[f"be{i + 1}"] = jnp.zeros((1, fan_out), jnp.float32)
    return params


def _pad2(a, rows, cols, val=0.0):
    r, c = a.shape
    return jnp.pad(a, ((0, rows - r), (0, cols - c)), constant_values=val)


def pack_params(params, input_size, hidden_sizes, output_size):
    """Zero-pad all feature (lane) dims to multiples of 128 and pack operands:
    one (8, H) tile for the 7 per-feature rows, one (3, H, H) stack for w2..w4.
    Padded lanes stay identically zero through every layer (zero weight cols,
    zero beta/bias, h=0 -> scale*0 + 0)."""
    h1, h2, h3 = hidden_sizes
    h1p, h2p, h3p = (_round_up(h, LANE) for h in (h1, h2, h3))
    outp = _round_up(output_size, LANE)
    # Packed fast path needs equal padded widths (true for all dims <= 128 here).
    assert h1p == h2p == h3p == outp, "packed layout needs equal padded widths"
    hp = h1p

    w1 = _pad2(params["w1"], input_size, hp)
    wstack = jnp.stack([
        _pad2(params["w2"], hp, hp),
        _pad2(params["w3"], hp, hp),
        _pad2(params["w4"], hp, hp),
    ], axis=0)
    rows = jnp.concatenate([
        _pad2(params["g1"], 1, hp, val=1.0),
        _pad2(params["be1"], 1, hp),
        _pad2(params["g2"], 1, hp, val=1.0),
        _pad2(params["be2"], 1, hp),
        _pad2(params["g3"], 1, hp, val=1.0),
        _pad2(params["be3"], 1, hp),
        _pad2(params["b4"], 1, hp),
        jnp.zeros((1, hp), jnp.float32),
    ], axis=0)
    return {"w1": w1, "wstack": wstack, "rows": rows}


def reference_forward(x, p):
    """Pure-JAX reference matching the PyTorch module (keeps the layer 1-3 biases,
    which provably cancel under training-mode BN)."""
    def bn_relu(h, g, be):
        mean = jnp.mean(h, axis=0, keepdims=True)
        var = jnp.mean((h - mean) ** 2, axis=0, keepdims=True)
        return jnp.maximum((h - mean) * jax.lax.rsqrt(var + BN_EPS) * g + be, 0.0)

    h = bn_relu(x @ p["w1"] + p["b1"], p["g1"], p["be1"])
    h = bn_relu(h @ p["w2"] + p["b2"], p["g2"], p["be2"])
    h = bn_relu(h @ p["w3"] + p["b3"], p["g3"], p["be3"])
    h = h @ p["w4"] + p["b4"]
    sp = jnp.log1p(jnp.exp(jnp.minimum(h, SOFTPLUS_THRESHOLD)))
    return jnp.where(h > SOFTPLUS_THRESHOLD, h, sp)


if __name__ == "__main__":
    key = jax.random.PRNGKey(0)
    k_x, k_p = jax.random.split(key)

    input_size = 16
    hidden_sizes = [32, 64, 32]
    output_size = 8
    batch = 8

    x = jax.random.normal(k_x, (batch, input_size), dtype=jnp.float32)
    params = init_params(k_p, input_size, hidden_sizes, output_size)
    packed = pack_params(params, input_size, hidden_sizes, output_size)

    out = mf_bn_net_forward(x, packed, output_size)
    jax.block_until_ready(out)

    ref = reference_forward(x, params)
    assert out.shape == (batch, output_size)
    assert bool(jnp.all(out > 0.0))                      # softplus output is positive
    assert bool(jnp.allclose(out, ref, rtol=1e-4, atol=1e-4))
    print("KERNEL_OK")
</pallas_src>

<mosaic_0001>
module attributes {stable_mosaic.version = 11 : i64} {
  func.func @_mlp_bn_kernel(%arg0: memref<8x16xf32, #tpu.memory_space<vmem>>, %arg1: memref<16x128xf32, #tpu.memory_space<vmem>>, %arg2: memref<3x128x128xf32, #tpu.memory_space<vmem>>, %arg3: memref<8x128xf32, #tpu.memory_space<vmem>>, %arg4: memref<8x128xf32, #tpu.memory_space<vmem>>) attributes {dimension_semantics = [], scalar_prefetch = 0 : i64, scratch_operands = 0 : i64, tpu.core_type = #tpu.core_type<tc>} {
    %c0 = arith.constant 0 : index
    %c0_0 = arith.constant 0 : index
    %0 = vector.load %arg0[%c0, %c0_0] : memref<8x16xf32, #tpu.memory_space<vmem>>, vector<8x16xf32>
    %c0_1 = arith.constant 0 : index
    %c0_2 = arith.constant 0 : index
    %1 = vector.load %arg3[%c0_1, %c0_2] : memref<8x128xf32, #tpu.memory_space<vmem>>, vector<8x128xf32>
    %c0_3 = arith.constant 0 : index
    %c0_4 = arith.constant 0 : index
    %2 = vector.load %arg1[%c0_3, %c0_4] : memref<16x128xf32, #tpu.memory_space<vmem>>, vector<16x128xf32>
    %cst = arith.constant dense<0.000000e+00> : vector<8x128xf32>
    %3 = tpu.matmul %0, %2, %cst {dimension_numbers = #tpu.dot_dimension_numbers<[1], [0], [0], [1], [0, 0, 1, 1], [], []>} : vector<8x16xf32>, vector<16x128xf32>, vector<8x128xf32> -> vector<8x128xf32>
    %4 = vector.extract_strided_slice %1 {offsets = [0, 0], sizes = [1, 128], strides = [1, 1]} : vector<8x128xf32> to vector<1x128xf32>
    %5 = vector.extract_strided_slice %1 {offsets = [1, 0], sizes = [1, 128], strides = [1, 1]} : vector<8x128xf32> to vector<1x128xf32>
    %cst_5 = arith.constant dense<0.000000e+00> : vector<128xf32>
    %6 = vector.multi_reduction <add>, %3, %cst_5 [0] : vector<8x128xf32> to vector<128xf32>
    %7 = vector.shape_cast %6 : vector<128xf32> to vector<1x128xf32>
    %cst_6 = arith.constant 1.250000e-01 : f32
    %8 = vector.broadcast %cst_6 : f32 to vector<1x128xf32>
    %9 = arith.mulf %7, %8 : vector<1x128xf32>
    %10 = arith.mulf %3, %3 : vector<8x128xf32>
    %cst_7 = arith.constant dense<0.000000e+00> : vector<128xf32>
    %11 = vector.multi_reduction <add>, %10, %cst_7 [0] : vector<8x128xf32> to vector<128xf32>
    %12 = vector.shape_cast %11 : vector<128xf32> to vector<1x128xf32>
    %cst_8 = arith.constant 1.250000e-01 : f32
    %13 = vector.broadcast %cst_8 : f32 to vector<1x128xf32>
    %14 = arith.mulf %12, %13 : vector<1x128xf32>
    %15 = arith.mulf %9, %9 : vector<1x128xf32>
    %16 = arith.subf %14, %15 : vector<1x128xf32>
    %cst_9 = arith.constant 9.99999974E-6 : f32
    %17 = vector.broadcast %cst_9 : f32 to vector<1x128xf32>
    %18 = arith.addf %16, %17 : vector<1x128xf32>
    %19 = math.rsqrt %18 : vector<1x128xf32>
    %20 = arith.mulf %4, %19 : vector<1x128xf32>
    %21 = arith.mulf %9, %20 : vector<1x128xf32>
    %22 = arith.subf %5, %21 : vector<1x128xf32>
    %23 = vector.broadcast %20 : vector<1x128xf32> to vector<8x128xf32>
    %24 = arith.mulf %3, %23 : vector<8x128xf32>
    %25 = vector.broadcast %22 : vector<1x128xf32> to vector<8x128xf32>
    %26 = arith.addf %24, %25 : vector<8x128xf32>
    %cst_10 = arith.constant 0.000000e+00 : f32
    %27 = vector.broadcast %cst_10 : f32 to vector<8x128xf32>
    %28 = arith.maximumf %26, %27 : vector<8x128xf32>
    %c0_11 = arith.constant 0 : index
    %c0_12 = arith.constant 0 : index
    %c0_13 = arith.constant 0 : index
    %29 = vector.load %arg2[%c0_11, %c0_12, %c0_13] : memref<3x128x128xf32, #tpu.memory_space<vmem>>, vector<1x128x128xf32>
    %30 = vector.shape_cast %29 : vector<1x128x128xf32> to vector<128x128xf32>
    %cst_14 = arith.constant dense<0.000000e+00> : vector<8x128xf32>
    %31 = tpu.matmul %28, %30, %cst_14 {dimension_numbers = #tpu.dot_dimension_numbers<[1], [0], [0], [1], [0, 0, 1, 1], [], []>} : vector<8x128xf32>, vector<128x128xf32>, vector<8x128xf32> -> vector<8x128xf32>
    %32 = vector.extract_strided_slice %1 {offsets = [2, 0], sizes = [1, 128], strides = [1, 1]} : vector<8x128xf32> to vector<1x128xf32>
    %33 = vector.extract_strided_slice %1 {offsets = [3, 0], sizes = [1, 128], strides = [1, 1]} : vector<8x128xf32> to vector<1x128xf32>
    %cst_15 = arith.constant dense<0.000000e+00> : vector<128xf32>
    %34 = vector.multi_reduction <add>, %31, %cst_15 [0] : vector<8x128xf32> to vector<128xf32>
    %35 = vector.shape_cast %34 : vector<128xf32> to vector<1x128xf32>
    %cst_16 = arith.constant 1.250000e-01 : f32
    %36 = vector.broadcast %cst_16 : f32 to vector<1x128xf32>
    %37 = arith.mulf %35, %36 : vector<1x128xf32>
    %38 = arith.mulf %31, %31 : vector<8x128xf32>
    %cst_17 = arith.constant dense<0.000000e+00> : vector<128xf32>
    %39 = vector.multi_reduction <add>, %38, %cst_17 [0] : vector<8x128xf32> to vector<128xf32>
    %40 = vector.shape_cast %39 : vector<128xf32> to vector<1x128xf32>
    %cst_18 = arith.constant 1.250000e-01 : f32
    %41 = vector.broadcast %cst_18 : f32 to vector<1x128xf32>
    %42 = arith.mulf %40, %41 : vector<1x128xf32>
    %43 = arith.mulf %37, %37 : vector<1x128xf32>
    %44 = arith.subf %42, %43 : vector<1x128xf32>
    %cst_19 = arith.constant 9.99999974E-6 : f32
    %45 = vector.broadcast %cst_19 : f32 to vector<1x128xf32>
    %46 = arith.addf %44, %45 : vector<1x128xf32>
    %47 = math.rsqrt %46 : vector<1x128xf32>
    %48 = arith.mulf %32, %47 : vector<1x128xf32>
    %49 = arith.mulf %37, %48 : vector<1x128xf32>
    %50 = arith.subf %33, %49 : vector<1x128xf32>
    %51 = vector.broadcast %48 : vector<1x128xf32> to vector<8x128xf32>
    %52 = arith.mulf %31, %51 : vector<8x128xf32>
    %53 = vector.broadcast %50 : vector<1x128xf32> to vector<8x128xf32>
    %54 = arith.addf %52, %53 : vector<8x128xf32>
    %cst_20 = arith.constant 0.000000e+00 : f32
    %55 = vector.broadcast %cst_20 : f32 to vector<8x128xf32>
    %56 = arith.maximumf %54, %55 : vector<8x128xf32>
    %c1 = arith.constant 1 : index
    %c0_21 = arith.constant 0 : index
    %c0_22 = arith.constant 0 : index
    %57 = vector.load %arg2[%c1, %c0_21, %c0_22] : memref<3x128x128xf32, #tpu.memory_space<vmem>>, vector<1x128x128xf32>
    %58 = vector.shape_cast %57 : vector<1x128x128xf32> to vector<128x128xf32>
    %cst_23 = arith.constant dense<0.000000e+00> : vector<8x128xf32>
    %59 = tpu.matmul %56, %58, %cst_23 {dimension_numbers = #tpu.dot_dimension_numbers<[1], [0], [0], [1], [0, 0, 1, 1], [], []>} : vector<8x128xf32>, vector<128x128xf32>, vector<8x128xf32> -> vector<8x128xf32>
    %60 = vector.extract_strided_slice %1 {offsets = [4, 0], sizes = [1, 128], strides = [1, 1]} : vector<8x128xf32> to vector<1x128xf32>
    %61 = vector.extract_strided_slice %1 {offsets = [5, 0], sizes = [1, 128], strides = [1, 1]} : vector<8x128xf32> to vector<1x128xf32>
    %cst_24 = arith.constant dense<0.000000e+00> : vector<128xf32>
    %62 = vector.multi_reduction <add>, %59, %cst_24 [0] : vector<8x128xf32> to vector<128xf32>
    %63 = vector.shape_cast %62 : vector<128xf32> to vector<1x128xf32>
    %cst_25 = arith.constant 1.250000e-01 : f32
    %64 = vector.broadcast %cst_25 : f32 to vector<1x128xf32>
    %65 = arith.mulf %63, %64 : vector<1x128xf32>
    %66 = arith.mulf %59, %59 : vector<8x128xf32>
    %cst_26 = arith.constant dense<0.000000e+00> : vector<128xf32>
    %67 = vector.multi_reduction <add>, %66, %cst_26 [0] : vector<8x128xf32> to vector<128xf32>
    %68 = vector.shape_cast %67 : vector<128xf32> to vector<1x128xf32>
    %cst_27 = arith.constant 1.250000e-01 : f32
    %69 = vector.broadcast %cst_27 : f32 to vector<1x128xf32>
    %70 = arith.mulf %68, %69 : vector<1x128xf32>
    %71 = arith.mulf %65, %65 : vector<1x128xf32>
    %72 = arith.subf %70, %71 : vector<1x128xf32>
    %cst_28 = arith.constant 9.99999974E-6 : f32
    %73 = vector.broadcast %cst_28 : f32 to vector<1x128xf32>
    %74 = arith.addf %72, %73 : vector<1x128xf32>
    %75 = math.rsqrt %74 : vector<1x128xf32>
    %76 = arith.mulf %60, %75 : vector<1x128xf32>
    %77 = arith.mulf %65, %76 : vector<1x128xf32>
    %78 = arith.subf %61, %77 : vector<1x128xf32>
    %79 = vector.broadcast %76 : vector<1x128xf32> to vector<8x128xf32>
    %80 = arith.mulf %59, %79 : vector<8x128xf32>
    %81 = vector.broadcast %78 : vector<1x128xf32> to vector<8x128xf32>
    %82 = arith.addf %80, %81 : vector<8x128xf32>
    %cst_29 = arith.constant 0.000000e+00 : f32
    %83 = vector.broadcast %cst_29 : f32 to vector<8x128xf32>
    %84 = arith.maximumf %82, %83 : vector<8x128xf32>
    %c2 = arith.constant 2 : index
    %c0_30 = arith.constant 0 : index
    %c0_31 = arith.constant 0 : index
    %85 = vector.load %arg2[%c2, %c0_30, %c0_31] : memref<3x128x128xf32, #tpu.memory_space<vmem>>, vector<1x128x128xf32>
    %86 = vector.shape_cast %85 : vector<1x128x128xf32> to vector<128x128xf32>
    %cst_32 = arith.constant dense<0.000000e+00> : vector<8x128xf32>
    %87 = tpu.matmul %84, %86, %cst_32 {dimension_numbers = #tpu.dot_dimension_numbers<[1], [0], [0], [1], [0, 0, 1, 1], [], []>} : vector<8x128xf32>, vector<128x128xf32>, vector<8x128xf32> -> vector<8x128xf32>
    %88 = vector.extract_strided_slice %1 {offsets = [6, 0], sizes = [1, 128], strides = [1, 1]} : vector<8x128xf32> to vector<1x128xf32>
    %89 = vector.broadcast %88 : vector<1x128xf32> to vector<8x128xf32>
    %90 = arith.addf %87, %89 : vector<8x128xf32>
    %cst_33 = arith.constant 2.000000e+01 : f32
    %91 = vector.broadcast %cst_33 : f32 to vector<8x128xf32>
    %92 = arith.minimumf %90, %91 : vector<8x128xf32>
    %93 = math.exp %92 : vector<8x128xf32>
    %94 = math.log1p %93 : vector<8x128xf32>
    %cst_34 = arith.constant 2.000000e+01 : f32
    %95 = vector.broadcast %cst_34 : f32 to vector<8x128xf32>
    %96 = arith.cmpf ogt, %90, %95 : vector<8x128xf32>
    %97 = arith.select %96, %90, %94 : vector<8x128xi1>, vector<8x128xf32>
    %c0_35 = arith.constant 0 : index
    %c0_36 = arith.constant 0 : index
    %98 = vector.load %arg4[%c0_35, %c0_36] : memref<8x128xf32, #tpu.memory_space<vmem>>, vector<8x128xf32>
    tpu.vector_store %arg4[%c0_35, %c0_36], %97 {strides = array<i32>} : memref<8x128xf32, #tpu.memory_space<vmem>>, vector<8x128xf32>,
    return
  }
}

</mosaic_0001>

<bundles_post_ra>
// kernel: tpu_custom_call.1
= control target key start
LH: loop header
LB: loop body
LE: loop exit
PB: predicated region body
PF: predicated region fallthrough
CT: control target
= control target key end

     0   :  { %9 = vsyncpa [#allocation3], 0  ;;  %s1035_s0 = inlined_call_operand.hbm [shape: f32[8,16], index: 0, kind: input, shape index: {}]   ;;  %s1036_s1 = inlined_call_operand.hbm [shape: f32[16,128], index: 1, kind: input, shape index: {}]   ;;  %s1037_s2 = inlined_call_operand.hbm [shape: f32[3,128,128], index: 2, kind: input, shape index: {}]   ;;  %s1038_s3 = inlined_call_operand.vmem [shape: f32[8,128], index: 3, kind: input, shape index: {}]   ;;  %s1039_s4 = inlined_call_operand.hbm [shape: f32[8,128], index: 4, kind: output, shape index: {}]  }
   0x1   :  { %10 = vsyncpa [#allocation6], 0 }
   0x2   :  { %11 = vsyncpa [#allocation4], 0  ;;  %s893_s15 = smov [#allocation5]   ;;  %s799_s19 = scalar_lea.hbm %s1036_s1, 256 }
   0x3   :  { %s27_s16 = sshll.u32 %s893_s15, 4  ;;  %p800_p0 = scmp.ne.s32.totalorder %s1036_s1, %s799_s19  ;;  %s28_s16 = int_to_ptr.vmem [resolvable:$true] %s27_s16 }
   0x4   :  { %p803_p1 = scmp.lt.u32.totalorder %s799_s19, %s1036_s1 }
   0x6   :  { %p805_p2 = pnand %p803_p1, %p800_p0 }
   0x8   :  { %808 = shalt.err (!%p805_p2)
}
   0x9   :  { %s809_s24 = scalar_lea.vmem %s28_s16, 256  ;;  %p814_p4 = scmp.lt.s32.totalorder %s28_s16, %s28_s16 }
   0xa   :  { %p810_p3 = scmp.ne.s32.totalorder %s28_s16, %s809_s24  ;;  %p815_p5 = scmp.lt.s32.totalorder %s809_s24, %s809_s24 }
   0xc   :  { %p816_p6 = por %p815_p5, %p814_p4 }
   0xe   :  { %p817_p7 = pnand %p816_p6, %p810_p3 }
  0x10   :  { %820 = shalt.err (!%p817_p7)
}
  0x11   :  { %s894_s25 = smov 128   ;;  %s895_s26 = smov 8  }
  0x12   :  { %33 = dma.hbm_to_vmem [thread:$0]  %s1036_s1, 256, %s28_s16, [#allocation6], %s894_s25, %s894_s25, %s895_s26  }
  0x13   :  { %s896_s29 = smov [#allocation2]   ;;  %s897_s5 = smov [#allocation7]  }
  0x14   :  { %s18_s30 = sshll.u32 %s896_s29, 4  ;;  %s39_s6 = sshll.u32 %s897_s5, 4  ;;  %s19_s30 = int_to_ptr.vmem [resolvable:$true] %s18_s30  ;;  %s40_s6 = int_to_ptr.vmem [resolvable:$true] %s39_s6 }
  0x15   :  { %s821_s9 = scalar_lea.hbm %s1035_s0, 128 }
  0x16   :  { %p822_p8 = scmp.ne.s32.totalorder %s1035_s0, %s821_s9  ;;  %p825_p9 = scmp.lt.u32.totalorder %s821_s9, %s1035_s0 }
  0x18   :  { %p827_p10 = pnand %p825_p9, %p822_p8 }
  0x1a   :  { %830 = shalt.err (!%p827_p10)
}
  0x1b   :  { %s831_s1 = scalar_lea.vmem %s19_s30, 128  ;;  %p836_p12 = scmp.lt.s32.totalorder %s19_s30, %s19_s30 }
  0x1c   :  { %p832_p11 = scmp.ne.s32.totalorder %s19_s30, %s831_s1  ;;  %p837_p13 = scmp.lt.s32.totalorder %s831_s1, %s831_s1 }
  0x1e   :  { %p838_p0 = por %p837_p13, %p836_p12 }
  0x20   :  { %p839_p1 = pnand %p838_p0, %p832_p11 }
  0x22   :  { %842 = shalt.err (!%p839_p1)
}
  0x23   :  { %21 = dma.hbm_to_vmem [thread:$0]  %s1035_s0, 128, %s19_s30, [#allocation3]  }
  0x24   :  { %s843_s18 = scalar_lea.hbm %s1037_s2, 6144 }
  0x25   :  { %p844_p2 = scmp.ne.s32.totalorder %s1037_s2, %s843_s18  ;;  %p847_p3 = scmp.lt.u32.totalorder %s843_s18, %s1037_s2 }
  0x27   :  { %p849_p4 = pnand %p847_p3, %p844_p2 }
  0x29   :  { %852 = shalt.err (!%p849_p4)
}
  0x2a   :  { %s853_s23 = scalar_lea.vmem %s40_s6, 6144  ;;  %p858_p6 = scmp.lt.s32.totalorder %s40_s6, %s40_s6 }
  0x2b   :  { %p854_p5 = scmp.ne.s32.totalorder %s40_s6, %s853_s23  ;;  %p859_p7 = scmp.lt.s32.totalorder %s853_s23, %s853_s23 }
  0x2d   :  { %p860_p8 = por %p859_p7, %p858_p6 }
  0x2f   :  { %p861_p9 = pnand %p860_p8, %p854_p5 }
  0x31   :  { %864 = shalt.err (!%p861_p9)
}
  0x32   :  { %45 = dma.hbm_to_vmem [thread:$0]  %s1037_s2, 6144, %s40_s6, [#allocation6], %s894_s25, %s894_s25, %s895_s26  }
  0x33   :  { %887 = dma.done.wait [#allocation3], 128  }
  0x34   :  { %888 = vsyncadd [#allocation3], 4294967168 }
  0x35   :  { %889 = dma.done.wait [#allocation6], 6400  }
  0x36   :  { %890 = vsyncadd [#allocation6], 4294960896  ;;  %v898_v0 = vmov 0.0|0.0   ;;  %vm899_vm0 = vmmov 0   ;;  %v900_v1 = vmov 0.0   ;;  %v59_v2 = vld [vmem:[#allocation5] sm:$0xff]  ;;  %v160_v50 = vlaneseq }
  0x37   :  { %705 = vmatprep.subr.bf16.mxu0 %v898_v0  ;;  %597 = vmatprep.mubr.msk.f32.mxu0 %vm899_vm0, %v900_v1  ;;  %v60_v3 = vld [vmem:[#allocation5 + $0x8] sm:$0xff]  ;;  %v57_v5 = vld [vmem:[#allocation2] sm:$0xff]  ;;  %vm61_vm1 = vcmask 130048   ;;  %v171_v6 = vld [vmem:[#allocation7] sm:$0xff] }
  0x38   :  { %708 = vmatprep.subr.bf16.mxu1 %v898_v0  ;;  %632 = vmatprep.mubr.msk.f32.mxu1 %vm899_vm0, %v900_v1  ;;  %v706_v4 = vpack.c.bf16 %v60_v3, %v59_v2  ;;  %v172_v7 = vld [vmem:[#allocation7 + $0x8] sm:$0xff]  ;;  %v173_v9 = vld [vmem:[#allocation7 + $0x10] sm:$0xff]  ;;  %v174_v10 = vld [vmem:[#allocation7 + $0x18] sm:$0xff]  ;;  %v986_v51 = vshrl.u32 %v160_v50, 7 }
  0x39   :  { %v709_v8 = vpack.c.bf16 %v172_v7, %v171_v6  ;;  %v712_v11 = vpack.c.bf16 %v174_v10, %v173_v9  ;;  %v175_v12 = vld [vmem:[#allocation7 + $0x20] sm:$0xff]  ;;  %v176_v13 = vld [vmem:[#allocation7 + $0x28] sm:$0xff]  ;;  %v177_v15 = vld [vmem:[#allocation7 + $0x30] sm:$0xff] }
  0x3a   :  { %707 = vmatpush3.bf16.msra.mxu0 %v706_v4  ;;  %v715_v14 = vpack.c.bf16 %v176_v13, %v175_v12  ;;  %v178_v16 = vld [vmem:[#allocation7 + $0x38] sm:$0xff]  ;;  %v179_v18 = vld [vmem:[#allocation7 + $0x40] sm:$0xff]  ;;  %v180_v19 = vld [vmem:[#allocation7 + $0x48] sm:$0xff]  ;;  %v162_v55 = vsub.s32 0, %v986_v51  ;;  %v167_v59 = vsub.s32 1, %v986_v51 }
  0x3b   :  { %732 = vmatprep.subr.bf16.mxu0 %v898_v0  ;;  %710 = vmatpush3.bf16.msra.mxu1 %v709_v8  ;;  %v718_v17 = vpack.c.bf16 %v178_v16, %v177_v15  ;;  %v721_v20 = vpack.c.bf16 %v180_v19, %v179_v18  ;;  %v181_v21 = vld [vmem:[#allocation7 + $0x50] sm:$0xff]  ;;  %v182_v22 = vld [vmem:[#allocation7 + $0x58] sm:$0xff]  ;;  %v183_v24 = vld [vmem:[#allocation7 + $0x60] sm:$0xff] }
  0x3c   :  { %711 = vmatprep.subr.bf16.mxu1 %v898_v0  ;;  %v724_v23 = vpack.c.bf16 %v182_v22, %v181_v21  ;;  %v184_v25 = vld [vmem:[#allocation7 + $0x68] sm:$0xff]  ;;  %v185_v26 = vld [vmem:[#allocation7 + $0x70] sm:$0xff]  ;;  %v186_v28 = vld [vmem:[#allocation7 + $0x78] sm:$0xff] }
  0x3d   :  { %598 = vmatmul.mubr.msk.f32.vlgmr.msra.gmra.mrb[0].mxu0 %vm61_vm1, %v57_v5  ;;  %v727_v27 = vpack.c.bf16 %v184_v25, %v183_v24  ;;  %v730_v29 = vpack.c.bf16 %v186_v28, %v185_v26  ;;  %v991_v52 = vld [vmem:[%s1038_s3] sm:$0xff]  ;;  %v294_v3 = vld [vmem:[#allocation7 + $0x80] sm:$0xff]  ;;  %v296_v6 = vld [vmem:[#allocation7 + $0x90] sm:$0xff]  ;;  %s901_s3 = smov [#allocation8]  }
  0x3e   :  { %667 = vmatprep.mubr.msk.f32.mxu0 %vm899_vm0, %v900_v1  ;;  %v295_v4 = vld [vmem:[#allocation7 + $0x88] sm:$0xff]  ;;  %v297_v7 = vld [vmem:[#allocation7 + $0x98] sm:$0xff]  ;;  %v298_v9 = vld [vmem:[#allocation7 + $0xa0] sm:$0xff]  ;;  %s528_s26 = sshll.u32 %s901_s3, 4  ;;  %s529_s26 = int_to_ptr.vmem [resolvable:$true] %s528_s26 }
  0x3f   :  { %713 = vmatpush3.bf16.msra.mxu1 %v712_v11  ;;  %v733_v5 = vpack.c.bf16 %v295_v4, %v294_v3  ;;  %v736_v8 = vpack.c.bf16 %v297_v7, %v296_v6  ;;  %v299_v10 = vld [vmem:[#allocation7 + $0xa8] sm:$0xff]  ;;  %v300_v12 = vld [vmem:[#allocation7 + $0xb0] sm:$0xff]  ;;  %v305_v18 = vld [vmem:[#allocation7 + $0xd8] sm:$0xff]  ;;  %s865_s27 = scalar_lea.vmem %s529_s26, 128  ;;  %p870_p11 = scmp.lt.s32.totalorder %s529_s26, %s529_s26 }
  0x40   :  { %714 = vmatprep.subr.bf16.mxu1 %v898_v0  ;;  %v739_v11 = vpack.c.bf16 %v299_v10, %v298_v9  ;;  %v303_v15 = vld [vmem:[#allocation7 + $0xc8] sm:$0xff]  ;;  %v309_v24 = vld [vmem:[#allocation7 + $0xf8] sm:$0xff]  ;;  %v421_v4 = vld [vmem:[#allocation7 + $0x120] sm:$0xff]  ;;  %p866_p10 = scmp.ne.s32.totalorder %s529_s26, %s865_s27  ;;  %p871_p12 = scmp.lt.s32.totalorder %s865_s27, %s865_s27 }
  0x41   :  { %734 = vmatpush3.bf16.msra.mxu0 %v733_v5  ;;  %v307_v21 = vld [vmem:[#allocation7 + $0xe8] sm:$0xff]  ;;  %v423_v7 = vld [vmem:[#allocation7 + $0x130] sm:$0xff]  ;;  %v425_v10 = vld [vmem:[#allocation7 + $0x140] sm:$0xff] }
  0x42   :  { %735 = vmatprep.subr.bf16.mxu0 %v898_v0  ;;  %v422_v5 = vld [vmem:[#allocation7 + $0x128] sm:$0xff]  ;;  %p872_p13 = por %p871_p12, %p870_p11 }
  0x43   :  { %716 = vmatpush3.bf16.msra.mxu1 %v715_v14  ;;  %v302_v14 = vld [vmem:[#allocation7 + $0xc0] sm:$0xff]  ;;  %v763_v6 = vpack.c.bf16 %v422_v5, %v421_v4 }
  0x44   :  { %717 = vmatprep.subr.bf16.mxu1 %v898_v0  ;;  %v745_v16 = vpack.c.bf16 %v303_v15, %v302_v14  ;;  %v429_v15 = vld [vmem:[#allocation7 + $0x160] sm:$0xff]  ;;  %p873_p0 = pnand %p872_p13, %p866_p10 }
  0x45   :  { %737 = vmatpush3.bf16.msra.mxu0 %v736_v8  ;;  %v424_v8 = vld [vmem:[#allocation7 + $0x138] sm:$0xff] }
  0x46   :  { %738 = vmatprep.subr.bf16.mxu0 %v898_v0  ;;  %v766_v9 = vpack.c.bf16 %v424_v8, %v423_v7 }
  0x47   :  { %719 = vmatpush3.bf16.msra.mxu1 %v718_v17  ;;  %v304_v17 = vld [vmem:[#allocation7 + $0xd0] sm:$0xff] }
  0x48   :  { %720 = vmatprep.subr.bf16.mxu1 %v898_v0  ;;  %v748_v19 = vpack.c.bf16 %v305_v18, %v304_v17  ;;  %v431_v18 = vld [vmem:[#allocation7 + $0x170] sm:$0xff] }
  0x49   :  { %740 = vmatpush3.bf16.msra.mxu0 %v739_v11  ;;  %v426_v11 = vld [vmem:[#allocation7 + $0x148] sm:$0xff] }
  0x4a   :  { %741 = vmatprep.subr.bf16.mxu0 %v898_v0 }
  0x4b   :  { %722 = vmatpush3.bf16.msra.mxu1 %v721_v20  ;;  %v306_v20 = vld [vmem:[#allocation7 + $0xe0] sm:$0xff] }
  0x4c   :  { %723 = vmatprep.subr.bf16.mxu1 %v898_v0  ;;  %v751_v22 = vpack.c.bf16 %v307_v21, %v306_v20 }
  0x4f   :  { %725 = vmatpush3.bf16.msra.mxu1 %v724_v23  ;;  %v308_v23 = vld [vmem:[#allocation7 + $0xf0] sm:$0xff] }
  0x50   :  { %726 = vmatprep.subr.bf16.mxu1 %v898_v0  ;;  %v754_v25 = vpack.c.bf16 %v309_v24, %v308_v23 }
  0x53   :  { %728 = vmatpush3.bf16.msra.mxu1 %v727_v27 }
  0x54   :  { %729 = vmatprep.subr.bf16.mxu1 %v898_v0 }
  0x57   :  { %731 = vmatpush3.bf16.msra.mxu1 %v730_v29 }
  0x58   :  { %756 = vmatprep.subr.bf16.mxu1 %v898_v0 }
 0x110   :  { %v131_v30 = vpop.f32.mrb[0].mxu0 }
 0x111   :  { %v135_v31 = vrot.slane %v131_v30, 4  ;;  %v142_v32 = vmul.f32 %v131_v30, %v131_v30  ;;  %v599_v33 = vpop.f32.mrb[1].mxu0 }
 0x113   :  { %v136_v34 = vadd.f32 %v135_v31, %v131_v30  ;;  %v143_v35 = vrot.slane %v142_v32, 4 }
 0x115   :  { %v137_v36 = vrot.slane %v136_v34, 2  ;;  %v144_v37 = vadd.f32 %v143_v35, %v142_v32 }
 0x117   :  { %v138_v38 = vadd.f32 %v137_v36, %v136_v34  ;;  %v145_v39 = vrot.slane %v144_v37, 2 }
 0x119   :  { %v139_v40 = vrot.slane %v138_v38, 1  ;;  %v146_v41 = vadd.f32 %v145_v39, %v144_v37 }
 0x11b   :  { %v140_v42 = vadd.f32 %v139_v40, %v138_v38  ;;  %v147_v43 = vrot.slane %v146_v41, 1 }
 0x11d   :  { %v141_v44 = vmul.f32 0.125, %v140_v42  ;;  %v148_v45 = vadd.f32 %v147_v43, %v146_v41 }
 0x11f   :  { %v149_v46 = vmul.f32 0.125, %v148_v45  ;;  %v150_v47 = vmul.f32 %v141_v44, %v141_v44 }
 0x121   :  { %v151_v48 = vsub.f32 %v149_v46, %v150_v47 }
 0x123   :  { %v152_v49 = vadd.f32 1e-05, %v151_v48  ;;  %v284_v48 = vsub.s32 2, %v986_v51 }
 0x125   :  { %789 = vrsqrt.f32 %v152_v49 }
 0x12f   :  { %v790_v53 = vpop.eup %789 }
 0x130   :  { %v154_v54 = vmul.f32 %v790_v53, %v991_v52 }
 0x132   :  { %v155_v56 = vmul.f32 %v154_v54, %v141_v44  ;;  %v163_v57 = vrot.slane %v154_v54, %v162_v55  ;;  %v289_v54 = vsub.s32 3, %v986_v51 }
 0x134   :  { %v157_v58 = vrot.slane %v155_v56, 7  ;;  %v164_v61 = vmul.f32 %v163_v57, %v131_v30 }
 0x136   :  { %v159_v60 = vsub.f32 %v991_v52, %v157_v58 }
 0x138   :  { %v168_v62 = vrot.slane %v159_v60, %v167_v59  ;;  %v417_v60 = vld [vmem:[#allocation7 + $0x100] sm:$0xff] }
 0x13a   :  { %v169_v63 = vadd.f32 %v168_v62, %v164_v61  ;;  %v418_v61 = vld [vmem:[#allocation7 + $0x108] sm:$0xff] }
 0x13b   :  { %v757_v62 = vpack.c.bf16 %v418_v61, %v417_v60 }
 0x13c   :  { %v170_v2 = vmax.f32 %v169_v63, 0.0  ;;  %v419_v63 = vld [vmem:[#allocation7 + $0x110] sm:$0xff] }
 0x13e   :  { %633 = vmatmul.mubr.f32.vlgmr.msra.gmra.mrb[0].mxu1 %v170_v2  ;;  %v420_v2 = vld [vmem:[#allocation7 + $0x118] sm:$0xff] }
 0x13f   :  { %702 = vmatprep.mubr.msk.f32.mxu1 %vm899_vm0, %v900_v1  ;;  %v301_v1 = vld [vmem:[#allocation7 + $0xb8] sm:$0xff]  ;;  %758 = vmatpush3.bf16.msra.mxu1 %v757_v62  ;;  %v760_v3 = vpack.c.bf16 %v420_v2, %v419_v63 }
 0x140   :  { %v742_v13 = vpack.c.bf16 %v301_v1, %v300_v12  ;;  %759 = vmatprep.subr.bf16.mxu1 %v898_v0  ;;  %v769_v12 = vpack.c.bf16 %v426_v11, %v425_v10  ;;  %v427_v1 = vld [vmem:[#allocation7 + $0x150] sm:$0xff] }
 0x142   :  { %743 = vmatpush3.bf16.msra.mxu0 %v742_v13  ;;  %v428_v13 = vld [vmem:[#allocation7 + $0x158] sm:$0xff] }
 0x143   :  { %744 = vmatprep.subr.bf16.mxu0 %v898_v0  ;;  %761 = vmatpush3.bf16.msra.mxu1 %v760_v3  ;;  %v772_v14 = vpack.c.bf16 %v428_v13, %v427_v1 }
 0x144   :  { %762 = vmatprep.subr.bf16.mxu1 %v898_v0 }
 0x146   :  { %746 = vmatpush3.bf16.msra.mxu0 %v745_v16  ;;  %v430_v16 = vld [vmem:[#allocation7 + $0x168] sm:$0xff] }
 0x147   :  { %747 = vmatprep.subr.bf16.mxu0 %v898_v0  ;;  %764 = vmatpush3.bf16.msra.mxu1 %v763_v6  ;;  %v775_v17 = vpack.c.bf16 %v430_v16, %v429_v15 }
 0x148   :  { %765 = vmatprep.subr.bf16.mxu1 %v898_v0 }
 0x14a   :  { %749 = vmatpush3.bf16.msra.mxu0 %v748_v19  ;;  %v432_v19 = vld [vmem:[#allocation7 + $0x178] sm:$0xff] }
 0x14b   :  { %750 = vmatprep.subr.bf16.mxu0 %v898_v0  ;;  %767 = vmatpush3.bf16.msra.mxu1 %v766_v9  ;;  %v778_v20 = vpack.c.bf16 %v432_v19, %v431_v18 }
 0x14c   :  { %768 = vmatprep.subr.bf16.mxu1 %v898_v0 }
 0x14e   :  { %752 = vmatpush3.bf16.msra.mxu0 %v751_v22 }
 0x14f   :  { %753 = vmatprep.subr.bf16.mxu0 %v898_v0  ;;  %770 = vmatpush3.bf16.msra.mxu1 %v769_v12 }
 0x150   :  { %771 = vmatprep.subr.bf16.mxu1 %v898_v0 }
 0x152   :  { %755 = vmatpush3.bf16.msra.mxu0 %v754_v25 }
 0x153   :  { %773 = vmatpush3.bf16.msra.mxu1 %v772_v14 }
 0x154   :  { %774 = vmatprep.subr.bf16.mxu1 %v898_v0 }
 0x157   :  { %776 = vmatpush3.bf16.msra.mxu1 %v775_v17 }
 0x158   :  { %777 = vmatprep.subr.bf16.mxu1 %v898_v0 }
 0x15b   :  { %779 = vmatpush3.bf16.msra.mxu1 %v778_v20 }
 0x211   :  { %v253_v26 = vpop.f32.mrb[0].mxu1 }
 0x212   :  { %v257_v27 = vrot.slane %v253_v26, 4  ;;  %v264_v28 = vmul.f32 %v253_v26, %v253_v26  ;;  %v634_v29 = vpop.f32.mrb[1].mxu1 }
 0x214   :  { %v258_v30 = vadd.f32 %v257_v27, %v253_v26  ;;  %v265_v31 = vrot.slane %v264_v28, 4 }
 0x216   :  { %v259_v32 = vrot.slane %v258_v30, 2  ;;  %v266_v33 = vadd.f32 %v265_v31, %v264_v28 }
 0x218   :  { %v260_v34 = vadd.f32 %v259_v32, %v258_v30  ;;  %v267_v35 = vrot.slane %v266_v33, 2 }
 0x21a   :  { %v261_v36 = vrot.slane %v260_v34, 1  ;;  %v268_v37 = vadd.f32 %v267_v35, %v266_v33 }
 0x21c   :  { %v262_v38 = vadd.f32 %v261_v36, %v260_v34  ;;  %v269_v39 = vrot.slane %v268_v37, 1 }
 0x21e   :  { %v263_v40 = vmul.f32 0.125, %v262_v38  ;;  %v270_v41 = vadd.f32 %v269_v39, %v268_v37 }
 0x220   :  { %v271_v42 = vmul.f32 0.125, %v270_v41  ;;  %v272_v43 = vmul.f32 %v263_v40, %v263_v40 }
 0x222   :  { %v273_v44 = vsub.f32 %v271_v42, %v272_v43  ;;  %v407_v42 = vsub.s32 4, %v986_v51 }
 0x224   :  { %v274_v45 = vadd.f32 1e-05, %v273_v44 }
 0x226   :  { %791 = vrsqrt.f32 %v274_v45 }
 0x230   :  { %v792_v46 = vpop.eup %791 }
 0x231   :  { %v276_v47 = vmul.f32 %v792_v46, %v991_v52  ;;  %v412_v46 = vsub.s32 5, %v986_v51 }
 0x233   :  { %v277_v49 = vmul.f32 %v276_v47, %v263_v40  ;;  %v285_v53 = vrot.slane %v276_v47, %v284_v48 }
 0x235   :  { %v279_v50 = vrot.slane %v277_v49, 7  ;;  %v286_v56 = vmul.f32 %v285_v53, %v253_v26 }
 0x237   :  { %v281_v55 = vsub.f32 %v991_v52, %v279_v50 }
 0x239   :  { %v290_v57 = vrot.slane %v281_v55, %v289_v54  ;;  %v435_v54 = vsub.s32 6, %v986_v51 }
 0x23b   :  { %v291_v58 = vadd.f32 %v290_v57, %v286_v56  ;;  %v436_v55 = vrot.slane %v991_v52, %v435_v54 }
 0x23d   :  { %v292_v59 = vmax.f32 %v291_v58, 0.0 }
 0x23f   :  { %668 = vmatmul.mubr.f32.vlgmr.msra.gmra.mrb[2].mxu0 %v292_v59 }
 0x312   :  { %v376_v21 = vpop.f32.mrb[2].mxu0 }
 0x313   :  { %v380_v22 = vrot.slane %v376_v21, 4  ;;  %v387_v23 = vmul.f32 %v376_v21, %v376_v21  ;;  %v669_v24 = vpop.f32.mrb[3].mxu0 }
 0x315   :  { %v381_v25 = vadd.f32 %v380_v22, %v376_v21  ;;  %v388_v26 = vrot.slane %v387_v23, 4 }
 0x317   :  { %v382_v27 = vrot.slane %v381_v25, 2  ;;  %v389_v28 = vadd.f32 %v388_v26, %v387_v23 }
 0x319   :  { %v383_v29 = vadd.f32 %v382_v27, %v381_v25  ;;  %v390_v30 = vrot.slane %v389_v28, 2 }
 0x31b   :  { %v384_v31 = vrot.slane %v383_v29, 1  ;;  %v391_v32 = vadd.f32 %v390_v30, %v389_v28 }
 0x31d   :  { %v385_v33 = vadd.f32 %v384_v31, %v383_v29  ;;  %v392_v34 = vrot.slane %v391_v32, 1 }
 0x31f   :  { %v386_v35 = vmul.f32 0.125, %v385_v33  ;;  %v393_v0 = vadd.f32 %v392_v34, %v391_v32 }
 0x321   :  { %v394_v36 = vmul.f32 0.125, %v393_v0  ;;  %v395_v37 = vmul.f32 %v386_v35, %v386_v35 }
 0x323   :  { %v396_v38 = vsub.f32 %v394_v36, %v395_v37 }
 0x325   :  { %v397_v39 = vadd.f32 1e-05, %v396_v38 }
 0x327   :  { %793 = vrsqrt.f32 %v397_v39 }
 0x331   :  { %v794_v40 = vpop.eup %793 }
 0x332   :  { %v399_v41 = vmul.f32 %v794_v40, %v991_v52 }
 0x334   :  { %v400_v43 = vmul.f32 %v399_v41, %v386_v35  ;;  %v408_v45 = vrot.slane %v399_v41, %v407_v42 }
 0x336   :  { %v402_v44 = vrot.slane %v400_v43, 7  ;;  %v409_v48 = vmul.f32 %v408_v45, %v376_v21 }
 0x338   :  { %v404_v47 = vsub.f32 %v991_v52, %v402_v44 }
 0x33a   :  { %v413_v49 = vrot.slane %v404_v47, %v412_v46 }
 0x33c   :  { %v414_v50 = vadd.f32 %v413_v49, %v409_v48 }
 0x33e   :  { %v415_v53 = vmax.f32 %v414_v50, 0.0 }
 0x340   :  { %703 = vmatmul.mubr.f32.vlgmr.msra.gmra.mrb[2].mxu1 %v415_v53 }
 0x413   :  { %v503_v56 = vpop.f32.mrb[2].mxu1 }
 0x414   :  { %v504_v57 = vadd.f32 %v503_v56, %v436_v55  ;;  %v704_v58 = vpop.f32.mrb[3].mxu1 }
 0x416   :  { %v507_v59 = vmin.f32 %v504_v57, 20.0  ;;  %vm519_vm3 = vcmp.gt.f32.partialorder %v504_v57, 20.0 }
 0x418   :  { %v508_v60 = vmul.f32 1.442695, %v507_v59 }
 0x41a   :  { %795 = vpow2.f32 %v508_v60 }
 0x424   :  { %v796_v61 = vpop.eup %795 }
 0x425   :  { %v510_v62 = vadd.f32 1.0, %v796_v61  ;;  %v513_v63 = vmul.f32 -0.5, %v796_v61  ;;  %v516_v3 = vand.u32 2147483647, %v796_v61 }
 0x427   :  { %797 = vlog2.f32 %v510_v62  ;;  %v514_v2 = vadd.f32 1.0, %v513_v63  ;;  %vm517_vm2 = vcmp.lt.f32.partialorder %v516_v3, 0.0004427343 }
 0x429   :  { %v515_v6 = vmul.f32 %v796_v61, %v514_v2 }
 0x431   :  { %v798_v4 = vpop.eup %797 }
 0x432   :  { %v512_v5 = vmul.f32 0.6931472, %v798_v4 }
 0x434   :  { %v518_v51 = vsel %vm517_vm2, %v515_v6, %v512_v5 }
 0x435   :  { %v520_v52 = vsel %vm519_vm3, %v504_v57, %v518_v51 }
 0x436   :  { %521 = vst [vmem:[#allocation8] sm:$0xff] %v520_v52 }
 0x437   :  { %876 = shalt.err (!%p873_p0)
}
 0x438   :  { %s877_s30 = scalar_lea.hbm %s1039_s4, 128 }
 0x439   :  { %p878_p1 = scmp.ne.s32.totalorder %s1039_s4, %s877_s30  ;;  %p881_p2 = scmp.lt.u32.totalorder %s877_s30, %s1039_s4 }
 0x43b   :  { %p883_p3 = pnand %p881_p2, %p878_p1 }
 0x43d   :  { %886 = shalt.err (!%p883_p3)
}
 0x43e   :  { %531 = dma.vmem_to_hbm [thread:$0]  %s529_s26, 128, %s1039_s4, [#allocation4]  }
 0x43f   :  { %891 = dma.done.wait [#allocation4], 128  }
 0x440   :  { %892 = vsyncadd [#allocation4], 4294967168 }
 0x441   :  { %535 = vsyncpa [#allocation3], 1 }
 0x442   :  { %536 = vsyncpa [#allocation6], 1 }
 0x443   :  { %537 = vsyncpa [#allocation4], 1 }

</bundles_post_ra>
